<compile_context>
chip_gen: v7x
topology: tpu7x:2x2x1
jax: 0.10.0
libtpu: 0.0.40
codegen_flags: <defaults>
</compile_context>

<pallas_src>
import functools

import jax
import jax.numpy as jnp
from jax.experimental import pallas as pl
from jax.experimental.pallas import tpu as pltpu


def _round_up(x: int, m: int) -> int:
    return (x + m - 1) // m * m


def _linout_kernel(x_ref, w1_ref, b1_ref, w2_ref, b2_ref, o_ref, *, bf16_epilogue):
    # First linear: bf16 operands on the MXU, f32 accumulation.
    h = jnp.dot(x_ref[...], w1_ref[...], preferred_element_type=jnp.float32)
    if bf16_epilogue:
        # v6e/v7x have a bf16 VPU: bias + ReLU in bf16 (half the VALU
        # slot-cycles / vreg pressure), result feeds the second dot directly.
        h_bf = jnp.maximum(h.astype(jnp.bfloat16) + b1_ref[...].astype(jnp.bfloat16), 0.0)
    else:
        # v5e has no bf16 VPU: keep the epilogue in f32, cast once for the MXU.
        h_bf = jnp.maximum(h + b1_ref[...], 0.0).astype(jnp.bfloat16)
    # TODO(synk): nn.Dropout(0.2) omitted (inference semantics -> identity).
    # Second linear (bf16 into MXU, f32 acc) + bias + Sigmoid (f32, 128-lane N).
    y = jnp.dot(h_bf, w2_ref[...], preferred_element_type=jnp.float32)
    o_ref[...] = jax.nn.sigmoid(y + b2_ref[...])


def linout_forward(x, w1, b1, w2, b2, *, tile_b: int = 512):
    """x: [B, ...] flattened to [B, in_size]; w1: [in, hidden], w2: [hidden, out].

    Returns [B, out_size] float32 (same math as torch Linear with W stored
    transposed, i.e. x @ W + b).
    """
    B = x.shape[0]
    in_size, hidden = w1.shape
    out_size = w2.shape[1]

    # Flatten (row-major, identical to nn.Flatten); bf16 at the kernel
    # boundary halves x HBM traffic and the x-tile VMEM footprint.
    x2d = x.reshape(B, -1).astype(jnp.bfloat16)
    assert x2d.shape[1] == in_size

    # --- Padding for lane/sublane alignment and batch tiling ---------------
    out_pad = _round_up(out_size, 128)                 # lane-dense output (exactly 128 for out=40)

    # Batch tile: multiple of 16 (bf16 sublane packing).
    tb = min(tile_b, _round_up(max(B, 16), 16))
    tb = _round_up(tb, 16)
    # Prefer >= 2 batch tiles so the "parallel" axis can span both TCs on v7x.
    if _round_up(B, tb) // tb < 2 and tb >= 32:
        tb_half = _round_up(tb // 2, 16)
        if _round_up(B, tb_half) // tb_half >= 2:
            tb = tb_half
    b_pad = _round_up(B, tb)
    if b_pad != B:
        x2d = jnp.pad(x2d, ((0, b_pad - B), (0, 0)))

    # Weights to bf16 (MXU-native, half the weight bytes); biases stay f32.
    w1_bf = w1.astype(jnp.bfloat16)
    w2_bf = jnp.pad(w2, ((0, 0), (0, out_pad - out_size))).astype(jnp.bfloat16)
    b1_2d = b1.reshape(1, hidden).astype(jnp.float32)
    b2_2d = jnp.pad(b2.reshape(1, out_size),
                    ((0, 0), (0, out_pad - out_size))).astype(jnp.float32)

    # bf16 epilogue only on chips with a bf16 VPU (v6e / v7x); f32 elsewhere.
    try:
        kind = jax.devices()[0].device_kind.lower()
    except Exception:
        kind = ""
    bf16_epilogue = ("v6" in kind) or ("v7" in kind)

    grid = (b_pad // tb,)

    # Explicit VMEM budget: resident weights (single-buffered) + biases
    # (padded to 8 sublanes) + double-buffered x/out tiles + tb x hidden
    # intermediate, with headroom.
    est = (w1_bf.size * 2 + w2_bf.size * 2
           + 8 * hidden * 4 + 8 * out_pad * 4
           + 2 * tb * in_size * 2
           + 2 * tb * out_pad * 4
           + tb * hidden * 4)
    vmem_limit = int(min(max(2 * est + (4 << 20), 32 << 20), 64 << 20))

    cost = pl.CostEstimate(
        flops=2 * b_pad * (in_size * hidden + hidden * out_pad),
        transcendentals=b_pad * out_pad,
        bytes_accessed=(x2d.size * 2 + w1_bf.size * 2 + w2_bf.size * 2
                        + b1_2d.size * 4 + b2_2d.size * 4 + b_pad * out_pad * 4),
    )

    kernel = functools.partial(_linout_kernel, bf16_epilogue=bf16_epilogue)

    def build(single_buffer_weights: bool):
        wkw = dict(pipeline_mode=pl.Buffered(1)) if single_buffer_weights else {}
        return pl.pallas_call(
            kernel,
            out_shape=jax.ShapeDtypeStruct((b_pad, out_pad), jnp.float32),
            grid=grid,
            in_specs=[
                # x: tiled over batch, software-pipelined against the matmuls.
                pl.BlockSpec((tb, in_size), lambda i: (i, 0)),
                # Weights / biases: constant block index -> VMEM-resident,
                # DMA'd once; single-buffered (no pipelining benefit).
                pl.BlockSpec((in_size, hidden), lambda i: (0, 0), **wkw),
                pl.BlockSpec((1, hidden), lambda i: (0, 0), **wkw),
                pl.BlockSpec((hidden, out_pad), lambda i: (0, 0), **wkw),
                pl.BlockSpec((1, out_pad), lambda i: (0, 0), **wkw),
            ],
            out_specs=pl.BlockSpec((tb, out_pad), lambda i: (i, 0)),
            compiler_params=pltpu.CompilerParams(
                # Batch tiles are independent -> shard across TCs on v7x.
                dimension_semantics=("parallel",),
                vmem_limit_bytes=vmem_limit,
            ),
            cost_estimate=cost,
        )

    # TODO(synk): for very large in_size, add a K grid axis over in_size with an
    # f32 VMEM accumulator (pl.when init/finalize) so VMEM stays bounded.
    try:
        out = build(True)(x2d, w1_bf, b1_2d, w2_bf, b2_2d)
    except Exception:
        # Fallback: default double-buffered weights (strictly more VMEM, same math).
        out = build(False)(x2d, w1_bf, b1_2d, w2_bf, b2_2d)

    return out[:B, :out_size]


if __name__ == "__main__":
    # Small shapes consistent with the module:
    #   input x: [B, C, H, W] = [2, 4, 4, 4] -> in_size = 64
    #   hidden  = 256 (module default is 2048; scaled down for a small test)
    #   out_size = 40 (length of out_list in the original script)
    B, C, H, W = 2, 4, 4, 4
    in_size = C * H * W
    hidden = 256
    out_size = 40

    key = jax.random.PRNGKey(0)
    kx, kw1, kb1, kw2, kb2 = jax.random.split(key, 5)

    x = jax.random.normal(kx, (B, C, H, W), dtype=jnp.float32)
    # Deterministic parameter init (torch.nn.Linear-style uniform bounds).
    lim1 = 1.0 / jnp.sqrt(in_size)
    lim2 = 1.0 / jnp.sqrt(hidden)
    w1 = jax.random.uniform(kw1, (in_size, hidden), minval=-lim1, maxval=lim1,
                            dtype=jnp.float32)
    b1 = jax.random.uniform(kb1, (hidden,), minval=-lim1, maxval=lim1,
                            dtype=jnp.float32)
    w2 = jax.random.uniform(kw2, (hidden, out_size), minval=-lim2, maxval=lim2,
                            dtype=jnp.float32)
    b2 = jax.random.uniform(kb2, (out_size,), minval=-lim2, maxval=lim2,
                            dtype=jnp.float32)

    out = linout_forward(x, w1, b1, w2, b2)
    out = jax.block_until_ready(out)
    assert out.shape == (B, out_size)

    # Reference 1: matched precision (bf16 x / weights into the dots, f32
    # accumulation, same epilogue precision as the kernel) -> tight tolerance.
    try:
        kind = jax.devices()[0].device_kind.lower()
    except Exception:
        kind = ""
    bf16_epi = ("v6" in kind) or ("v7" in kind)

    x2d = x.reshape(B, -1)
    h_acc = jnp.dot(x2d.astype(jnp.bfloat16), w1.astype(jnp.bfloat16),
                    preferred_element_type=jnp.float32)
    if bf16_epi:
        h_ref = jnp.maximum(h_acc.astype(jnp.bfloat16) + b1.astype(jnp.bfloat16), 0.0)
    else:
        h_ref = jnp.maximum(h_acc + b1, 0.0).astype(jnp.bfloat16)
    y_ref = jnp.dot(h_ref, w2.astype(jnp.bfloat16),
                    preferred_element_type=jnp.float32) + b2
    ref_matched = jax.nn.sigmoid(y_ref)
    assert jnp.allclose(out, ref_matched, atol=2e-3, rtol=2e-3)

    # Reference 2: full f32 math (module semantics) -> loose tolerance
    # accounting for bf16 x / weight / intermediate quantization.
    ref_f32 = jax.nn.sigmoid(jnp.maximum(x2d @ w1 + b1, 0.0) @ w2 + b2)
    assert jnp.allclose(out, ref_f32, atol=5e-2, rtol=5e-2)

    print("KERNEL_OK")
</pallas_src>

<mosaic_0001>
module attributes {stable_mosaic.version = 11 : i64} {
  func.func @_linout_kernel(%arg0: i32, %arg1: memref<16x64xbf16, #tpu.memory_space<vmem>>, %arg2: memref<64x256xbf16, #tpu.memory_space<vmem>>, %arg3: memref<1x256xf32, #tpu.memory_space<vmem>>, %arg4: memref<256x128xbf16, #tpu.memory_space<vmem>>, %arg5: memref<1x128xf32, #tpu.memory_space<vmem>>, %arg6: memref<16x128xf32, #tpu.memory_space<vmem>>) attributes {dimension_semantics = [#tpu.dimension_semantics<parallel>], iteration_bounds = array<i64: 1>, scalar_prefetch = 0 : i64, scratch_operands = 0 : i64, tpu.core_type = #tpu.core_type<tc>, window_params = [{transform_indices = @transform_0, window_bounds = array<i64: 16, 64>}, {pipeline_mode = #tpu.pipeline_mode<synchronous>, transform_indices = @transform_1, window_bounds = array<i64: 64, 256>}, {pipeline_mode = #tpu.pipeline_mode<synchronous>, transform_indices = @transform_2, window_bounds = array<i64: 1, 256>}, {pipeline_mode = #tpu.pipeline_mode<synchronous>, transform_indices = @transform_3, window_bounds = array<i64: 256, 128>}, {pipeline_mode = #tpu.pipeline_mode<synchronous>, transform_indices = @transform_4, window_bounds = array<i64: 1, 128>}, {transform_indices = @transform_5, window_bounds = array<i64: 16, 128>}]} {
    %c0 = arith.constant 0 : index
    %c0_0 = arith.constant 0 : index
    %0 = vector.load %arg1[%c0, %c0_0] : memref<16x64xbf16, #tpu.memory_space<vmem>>, vector<16x64xbf16>
    %c0_1 = arith.constant 0 : index
    %c0_2 = arith.constant 0 : index
    %1 = vector.load %arg2[%c0_1, %c0_2] : memref<64x256xbf16, #tpu.memory_space<vmem>>, vector<64x256xbf16>
    %cst = arith.constant dense<0.000000e+00> : vector<16x256xf32>
    %2 = tpu.matmul %0, %1, %cst {dimension_numbers = #tpu.dot_dimension_numbers<[1], [0], [0], [1], [0, 0, 1, 1], [], []>} : vector<16x64xbf16>, vector<64x256xbf16>, vector<16x256xf32> -> vector<16x256xf32>
    %c0_3 = arith.constant 0 : index
    %c0_4 = arith.constant 0 : index
    %3 = vector.load %arg3[%c0_3, %c0_4] : memref<1x256xf32, #tpu.memory_space<vmem>>, vector<1x256xf32>
    %4 = vector.broadcast %3 : vector<1x256xf32> to vector<16x256xf32>
    %5 = arith.addf %2, %4 : vector<16x256xf32>
    %cst_5 = arith.constant 0.000000e+00 : f32
    %6 = vector.broadcast %cst_5 : f32 to vector<16x256xf32>
    %7 = arith.maximumf %5, %6 : vector<16x256xf32>
    %8 = arith.truncf %7 : vector<16x256xf32> to vector<16x256xbf16>
    %c0_6 = arith.constant 0 : index
    %c0_7 = arith.constant 0 : index
    %9 = vector.load %arg4[%c0_6, %c0_7] : memref<256x128xbf16, #tpu.memory_space<vmem>>, vector<256x128xbf16>
    %cst_8 = arith.constant dense<0.000000e+00> : vector<16x128xf32>
    %10 = tpu.matmul %8, %9, %cst_8 {dimension_numbers = #tpu.dot_dimension_numbers<[1], [0], [0], [1], [0, 0, 1, 1], [], []>} : vector<16x256xbf16>, vector<256x128xbf16>, vector<16x128xf32> -> vector<16x128xf32>
    %c0_9 = arith.constant 0 : index
    %c0_10 = arith.constant 0 : index
    %11 = vector.load %arg5[%c0_9, %c0_10] : memref<1x128xf32, #tpu.memory_space<vmem>>, vector<1x128xf32>
    %12 = vector.broadcast %11 : vector<1x128xf32> to vector<16x128xf32>
    %13 = arith.addf %10, %12 : vector<16x128xf32>
    %14 = arith.negf %13 : vector<16x128xf32>
    %15 = math.exp %14 : vector<16x128xf32>
    %cst_11 = arith.constant 1.000000e+00 : f32
    %16 = vector.broadcast %cst_11 : f32 to vector<16x128xf32>
    %17 = arith.addf %16, %15 : vector<16x128xf32>
    %18 = arith.divf %16, %17 : vector<16x128xf32>
    %c0_12 = arith.constant 0 : index
    %c0_13 = arith.constant 0 : index
    %19 = vector.load %arg6[%c0_12, %c0_13] : memref<16x128xf32, #tpu.memory_space<vmem>>, vector<16x128xf32>
    tpu.vector_store %arg6[%c0_12, %c0_13], %18 {strides = array<i32>} : memref<16x128xf32, #tpu.memory_space<vmem>>, vector<16x128xf32>,
    return
  }
  func.func @transform_0(%arg0: i32) -> (i32, i32) {
    %c0_i32 = arith.constant 0 : i32
    %c0_i32_0 = arith.constant 0 : i32
    return %arg0, %c0_i32 : i32, i32
  }
  func.func @transform_1(%arg0: i32) -> (i32, i32) {
    %c0_i32 = arith.constant 0 : i32
    %c0_i32_0 = arith.constant 0 : i32
    %c0_i32_1 = arith.constant 0 : i32
    return %c0_i32, %c0_i32_0 : i32, i32
  }
  func.func @transform_2(%arg0: i32) -> (i32, i32) {
    %c0_i32 = arith.constant 0 : i32
    %c0_i32_0 = arith.constant 0 : i32
    %c0_i32_1 = arith.constant 0 : i32
    return %c0_i32, %c0_i32_0 : i32, i32
  }
  func.func @transform_3(%arg0: i32) -> (i32, i32) {
    %c0_i32 = arith.constant 0 : i32
    %c0_i32_0 = arith.constant 0 : i32
    %c0_i32_1 = arith.constant 0 : i32
    return %c0_i32, %c0_i32_0 : i32, i32
  }
  func.func @transform_4(%arg0: i32) -> (i32, i32) {
    %c0_i32 = arith.constant 0 : i32
    %c0_i32_0 = arith.constant 0 : i32
    %c0_i32_1 = arith.constant 0 : i32
    return %c0_i32, %c0_i32_0 : i32, i32
  }
  func.func @transform_5(%arg0: i32) -> (i32, i32) {
    %c0_i32 = arith.constant 0 : i32
    %c0_i32_0 = arith.constant 0 : i32
    return %arg0, %c0_i32 : i32, i32
  }
}

module attributes {stable_mosaic.version = 11 : i64} {
  func.func @_linout_kernel(%arg0: i32, %arg1: memref<16x64xbf16, #tpu.memory_space<vmem>>, %arg2: memref<64x256xbf16, #tpu.memory_space<vmem>>, %arg3: memref<1x256xf32, #tpu.memory_space<vmem>>, %arg4: memref<256x128xbf16, #tpu.memory_space<vmem>>, %arg5: memref<1x128xf32, #tpu.memory_space<vmem>>, %arg6: memref<16x128xf32, #tpu.memory_space<vmem>>) attributes {dimension_semantics = [#tpu.dimension_semantics<parallel>], iteration_bounds = array<i64: 1>, scalar_prefetch = 0 : i64, scratch_operands = 0 : i64, tpu.core_type = #tpu.core_type<tc>, window_params = [{transform_indices = @transform_0, window_bounds = array<i64: 16, 64>}, {pipeline_mode = #tpu.pipeline_mode<synchronous>, transform_indices = @transform_1, window_bounds = array<i64: 64, 256>}, {pipeline_mode = #tpu.pipeline_mode<synchronous>, transform_indices = @transform_2, window_bounds = array<i64: 1, 256>}, {pipeline_mode = #tpu.pipeline_mode<synchronous>, transform_indices = @transform_3, window_bounds = array<i64: 256, 128>}, {pipeline_mode = #tpu.pipeline_mode<synchronous>, transform_indices = @transform_4, window_bounds = array<i64: 1, 128>}, {transform_indices = @transform_5, window_bounds = array<i64: 16, 128>}]} {
    %c0 = arith.constant 0 : index
    %c0_0 = arith.constant 0 : index
    %0 = vector.load %arg1[%c0, %c0_0] : memref<16x64xbf16, #tpu.memory_space<vmem>>, vector<16x64xbf16>
    %c0_1 = arith.constant 0 : index
    %c0_2 = arith.constant 0 : index
    %1 = vector.load %arg2[%c0_1, %c0_2] : memref<64x256xbf16, #tpu.memory_space<vmem>>, vector<64x256xbf16>
    %cst = arith.constant dense<0.000000e+00> : vector<16x256xf32>
    %2 = tpu.matmul %0, %1, %cst {dimension_numbers = #tpu.dot_dimension_numbers<[1], [0], [0], [1], [0, 0, 1, 1], [], []>} : vector<16x64xbf16>, vector<64x256xbf16>, vector<16x256xf32> -> vector<16x256xf32>
    %c0_3 = arith.constant 0 : index
    %c0_4 = arith.constant 0 : index
    %3 = vector.load %arg3[%c0_3, %c0_4] : memref<1x256xf32, #tpu.memory_space<vmem>>, vector<1x256xf32>
    %4 = vector.broadcast %3 : vector<1x256xf32> to vector<16x256xf32>
    %5 = arith.addf %2, %4 : vector<16x256xf32>
    %cst_5 = arith.constant 0.000000e+00 : f32
    %6 = vector.broadcast %cst_5 : f32 to vector<16x256xf32>
    %7 = arith.maximumf %5, %6 : vector<16x256xf32>
    %8 = arith.truncf %7 : vector<16x256xf32> to vector<16x256xbf16>
    %c0_6 = arith.constant 0 : index
    %c0_7 = arith.constant 0 : index
    %9 = vector.load %arg4[%c0_6, %c0_7] : memref<256x128xbf16, #tpu.memory_space<vmem>>, vector<256x128xbf16>
    %cst_8 = arith.constant dense<0.000000e+00> : vector<16x128xf32>
    %10 = tpu.matmul %8, %9, %cst_8 {dimension_numbers = #tpu.dot_dimension_numbers<[1], [0], [0], [1], [0, 0, 1, 1], [], []>} : vector<16x256xbf16>, vector<256x128xbf16>, vector<16x128xf32> -> vector<16x128xf32>
    %c0_9 = arith.constant 0 : index
    %c0_10 = arith.constant 0 : index
    %11 = vector.load %arg5[%c0_9, %c0_10] : memref<1x128xf32, #tpu.memory_space<vmem>>, vector<1x128xf32>
    %12 = vector.broadcast %11 : vector<1x128xf32> to vector<16x128xf32>
    %13 = arith.addf %10, %12 : vector<16x128xf32>
    %14 = arith.negf %13 : vector<16x128xf32>
    %15 = math.exp %14 : vector<16x128xf32>
    %cst_11 = arith.constant 1.000000e+00 : f32
    %16 = vector.broadcast %cst_11 : f32 to vector<16x128xf32>
    %17 = arith.addf %16, %15 : vector<16x128xf32>
    %18 = arith.divf %16, %17 : vector<16x128xf32>
    %c0_12 = arith.constant 0 : index
    %c0_13 = arith.constant 0 : index
    %19 = vector.load %arg6[%c0_12, %c0_13] : memref<16x128xf32, #tpu.memory_space<vmem>>, vector<16x128xf32>
    tpu.vector_store %arg6[%c0_12, %c0_13], %18 {strides = array<i32>} : memref<16x128xf32, #tpu.memory_space<vmem>>, vector<16x128xf32>,
    return
  }
  func.func @transform_0(%arg0: i32) -> (i32, i32) {
    %c0_i32 = arith.constant 0 : i32
    %c0_i32_0 = arith.constant 0 : i32
    return %arg0, %c0_i32 : i32, i32
  }
  func.func @transform_1(%arg0: i32) -> (i32, i32) {
    %c0_i32 = arith.constant 0 : i32
    %c0_i32_0 = arith.constant 0 : i32
    %c0_i32_1 = arith.constant 0 : i32
    return %c0_i32, %c0_i32_0 : i32, i32
  }
  func.func @transform_2(%arg0: i32) -> (i32, i32) {
    %c0_i32 = arith.constant 0 : i32
    %c0_i32_0 = arith.constant 0 : i32
    %c0_i32_1 = arith.constant 0 : i32
    return %c0_i32, %c0_i32_0 : i32, i32
  }
  func.func @transform_3(%arg0: i32) -> (i32, i32) {
    %c0_i32 = arith.constant 0 : i32
    %c0_i32_0 = arith.constant 0 : i32
    %c0_i32_1 = arith.constant 0 : i32
    return %c0_i32, %c0_i32_0 : i32, i32
  }
  func.func @transform_4(%arg0: i32) -> (i32, i32) {
    %c0_i32 = arith.constant 0 : i32
    %c0_i32_0 = arith.constant 0 : i32
    %c0_i32_1 = arith.constant 0 : i32
    return %c0_i32, %c0_i32_0 : i32, i32
  }
  func.func @transform_5(%arg0: i32) -> (i32, i32) {
    %c0_i32 = arith.constant 0 : i32
    %c0_i32_0 = arith.constant 0 : i32
    return %arg0, %c0_i32 : i32, i32
  }
}

</mosaic_0001>

<bundles_post_ra>
// kernel: tpu_custom_call.1
= control target key start
LH: loop header
LB: loop body
LE: loop exit
PB: predicated region body
PF: predicated region fallthrough
CT: control target
= control target key end

     0   :  { %10 = vsyncpa [#allocation3], 0  ;;  %s681_s0 = inlined_call_operand.hbm [shape: bf16[16,64], index: 0, kind: input, shape index: {}]   ;;  %s682_s1 = inlined_call_operand.hbm [shape: bf16[64,256], index: 1, kind: input, shape index: {}]   ;;  %s683_s2 = inlined_call_operand.vmem [shape: f32[1,256], index: 2, kind: input, shape index: {}]   ;;  %s684_s3 = inlined_call_operand.hbm [shape: bf16[256,128], index: 3, kind: input, shape index: {}]   ;;  %s685_s4 = inlined_call_operand.vmem [shape: f32[1,128], index: 4, kind: input, shape index: {}]   ;;  %s686_s5 = inlined_call_operand.hbm [shape: f32[16,128], index: 5, kind: output, shape index: {}]  }
   0x1   :  { %11 = vsyncpa [#allocation6], 0 }
   0x2   :  { %12 = vsyncpa [#allocation4], 0  ;;  %s582_s18 = smov [#allocation5]   ;;  %s488_s22 = scalar_lea.hbm %s682_s1, 1024 }
   0x3   :  { %s30_s19 = sshll.u32 %s582_s18, 4  ;;  %p489_p0 = scmp.ne.s32.totalorder %s682_s1, %s488_s22  ;;  %s31_s19 = int_to_ptr.vmem [resolvable:$true] %s30_s19 }
   0x4   :  { %p492_p1 = scmp.lt.u32.totalorder %s488_s22, %s682_s1 }
   0x6   :  { %p494_p2 = pnand %p492_p1, %p489_p0 }
   0x8   :  { %497 = shalt.err (!%p494_p2)
}
   0x9   :  { %s498_s27 = scalar_lea.vmem %s31_s19, 1024  ;;  %p503_p4 = scmp.lt.s32.totalorder %s31_s19, %s31_s19 }
   0xa   :  { %p499_p3 = scmp.ne.s32.totalorder %s31_s19, %s498_s27  ;;  %p504_p5 = scmp.lt.s32.totalorder %s498_s27, %s498_s27 }
   0xc   :  { %p505_p6 = por %p504_p5, %p503_p4 }
   0xe   :  { %p506_p7 = pnand %p505_p6, %p499_p3 }
  0x10   :  { %509 = shalt.err (!%p506_p7)
}
  0x11   :  { %s583_s28 = smov 128   ;;  %s584_s29 = smov 8  }
  0x12   :  { %36 = dma.hbm_to_vmem [thread:$0]  %s682_s1, 1024, %s31_s19, [#allocation6], %s583_s28, %s583_s28, %s584_s29  }
  0x13   :  { %s585_s7 = smov [#allocation2]   ;;  %s510_s11 = scalar_lea.hbm %s681_s0, 128 }
  0x14   :  { %s18_s8 = sshll.u32 %s585_s7, 4  ;;  %p511_p8 = scmp.ne.s32.totalorder %s681_s0, %s510_s11  ;;  %s19_s8 = int_to_ptr.vmem [resolvable:$true] %s18_s8 }
  0x15   :  { %p514_p9 = scmp.lt.u32.totalorder %s510_s11, %s681_s0 }
  0x17   :  { %p516_p10 = pnand %p514_p9, %p511_p8 }
  0x19   :  { %519 = shalt.err (!%p516_p10)
}
  0x1a   :  { %s520_s16 = scalar_lea.vmem %s19_s8, 128  ;;  %p525_p12 = scmp.lt.s32.totalorder %s19_s8, %s19_s8 }
  0x1b   :  { %p521_p11 = scmp.ne.s32.totalorder %s19_s8, %s520_s16  ;;  %p526_p13 = scmp.lt.s32.totalorder %s520_s16, %s520_s16 }
  0x1d   :  { %p527_p0 = por %p526_p13, %p525_p12 }
  0x1f   :  { %p528_p1 = pnand %p527_p0, %p521_p11 }
  0x21   :  { %531 = shalt.err (!%p528_p1)
}
  0x22   :  { %s586_s1 = smov 64   ;;  %s587_s17 = smov 4  }
  0x23   :  { %24 = dma.hbm_to_vmem [thread:$0]  %s681_s0, 128, %s19_s8, [#allocation3], %s586_s1, %s586_s1, %s587_s17  }
  0x24   :  { %s588_s20 = smov [#allocation7]   ;;  %s532_s24 = scalar_lea.hbm %s684_s3, 2048 }
  0x25   :  { %s44_s21 = sshll.u32 %s588_s20, 4  ;;  %p533_p2 = scmp.ne.s32.totalorder %s684_s3, %s532_s24  ;;  %s45_s21 = int_to_ptr.vmem [resolvable:$true] %s44_s21 }
  0x26   :  { %p536_p3 = scmp.lt.u32.totalorder %s532_s24, %s684_s3 }
  0x28   :  { %p538_p4 = pnand %p536_p3, %p533_p2 }
  0x2a   :  { %541 = shalt.err (!%p538_p4)
}
  0x2b   :  { %s542_s6 = scalar_lea.vmem %s45_s21, 2048  ;;  %p547_p6 = scmp.lt.s32.totalorder %s45_s21, %s45_s21 }
  0x2c   :  { %p543_p5 = scmp.ne.s32.totalorder %s45_s21, %s542_s6  ;;  %p548_p7 = scmp.lt.s32.totalorder %s542_s6, %s542_s6 }
  0x2e   :  { %p549_p8 = por %p548_p7, %p547_p6 }
  0x30   :  { %p550_p9 = pnand %p549_p8, %p543_p5 }
  0x32   :  { %553 = shalt.err (!%p550_p9)
}
  0x33   :  { %50 = dma.hbm_to_vmem [thread:$0]  %s684_s3, 2048, %s45_s21, [#allocation6], %s586_s1, %s586_s1, %s587_s17  }
  0x34   :  { %576 = dma.done.wait [#allocation3], 128  }
  0x35   :  { %577 = vsyncadd [#allocation3], 4294967168 }
  0x36   :  { %578 = dma.done.wait [#allocation6], 3072  }
  0x37   :  { %579 = vsyncadd [#allocation6], 4294964224  ;;  %v589_v0 = vmov 0   ;;  %v451_v1 = vld [vmem:[#allocation5 + $0x4] ss:$8 sps:$4 sm:$0xff]   ;;  %v468_v13 = vld [vmem:[#allocation7 + $0x50] sm:$0xff]   ;;  %v75_v26 = vlaneseq }
  0x38   :  { %166 = vmatprep.mubr.bf16.mxu0 %v589_v0  ;;  %v453_v2 = vld [vmem:[#allocation5] ss:$8 sps:$4 sm:$0xff]   ;;  %134 = vmatprep.subr.bf16.mxu0 %v451_v1  ;;  %v454_v3 = vld [vmem:[#allocation5 + $0x14] ss:$8 sps:$4 sm:$0xff]   ;;  %v456_v4 = vld [vmem:[#allocation5 + $0x10] ss:$8 sps:$4 sm:$0xff]  }
  0x39   :  { %135 = vmatpush1.bf16.msra.mxu0 %v453_v2  ;;  %v457_v5 = vld [vmem:[#allocation5 + $0x24] ss:$8 sps:$4 sm:$0xff]   ;;  %v459_v6 = vld [vmem:[#allocation5 + $0x20] ss:$8 sps:$4 sm:$0xff]   ;;  %v460_v7 = vld [vmem:[#allocation5 + $0x34] ss:$8 sps:$4 sm:$0xff]  }
  0x3a   :  { %136 = vmatprep.subr.bf16.mxu0 %v454_v3  ;;  %v464_v8 = vld [vmem:[#allocation7 + $0x40] sm:$0xff]   ;;  %v462_v10 = vld [vmem:[#allocation5 + $0x30] ss:$8 sps:$4 sm:$0xff]   ;;  %v466_v11 = vld [vmem:[#allocation7 + $0x48] sm:$0xff]   ;;  %vm130_vm0 = vcmask 523264   ;;  %v76_v27 = vshrl.u32 %v75_v26, 7 }
  0x3b   :  { %v465_v9 = vld [vmem:[#allocation7] sm:$0xff]   ;;  %420 = vmatprep.subr.bf16.mxu1 %v464_v8  ;;  %v467_v12 = vld [vmem:[#allocation7 + $0x8] sm:$0xff]   ;;  %v463_v14 = vld [vmem:[#allocation2] sm:$0xff]   ;;  %s590_s10 = smov [#allocation8]  }
  0x3c   :  { %421 = vmatpush3.bf16.msra.mxu1 %v465_v9  ;;  %v469_v15 = vld [vmem:[#allocation7 + $0x10] sm:$0xff]   ;;  %v470_v16 = vld [vmem:[#allocation7 + $0x58] sm:$0xff]   ;;  %v472_v18 = vld [vmem:[#allocation7 + $0x60] sm:$0xff]   ;;  %v77_v28 = vsub.s32 0, %v76_v27  ;;  %v81_v30 = vsub.s32 1, %v76_v27  ;;  %s378_s11 = sshll.u32 %s590_s10, 4  ;;  %s379_s11 = int_to_ptr.vmem [resolvable:$true] %s378_s11 }
  0x3d   :  { %137 = vmatpush1.bf16.msra.mxu0 %v456_v4  ;;  %422 = vmatprep.subr.bf16.mxu1 %v466_v11  ;;  %v471_v17 = vld [vmem:[#allocation7 + $0x18] sm:$0xff]   ;;  %v473_v19 = vld [vmem:[#allocation7 + $0x20] sm:$0xff]   ;;  %v474_v20 = vld [vmem:[#allocation7 + $0x68] sm:$0xff]   ;;  %p559_p11 = scmp.lt.s32.totalorder %s379_s11, %s379_s11 }
  0x3e   :  { %138 = vmatprep.subr.bf16.mxu0 %v457_v5  ;;  %v475_v21 = vld [vmem:[#allocation7 + $0x28] sm:$0xff]   ;;  %v476_v22 = vld [vmem:[#allocation7 + $0x70] sm:$0xff]   ;;  %v478_v24 = vld [vmem:[#allocation7 + $0x78] sm:$0xff]  }
  0x3f   :  { %v477_v23 = vld [vmem:[#allocation7 + $0x30] sm:$0xff]   ;;  %v479_v25 = vld [vmem:[#allocation7 + $0x38] sm:$0xff]  }
  0x40   :  { %423 = vmatpush3.bf16.msra.mxu1 %v467_v12  ;;  %v73_v29 = vld [vmem:[%s683_s2] sm:$0x3] }
  0x41   :  { %139 = vmatpush1.bf16.msra.mxu0 %v459_v6  ;;  %424 = vmatprep.subr.bf16.mxu1 %v468_v13  ;;  %v78_v31 = vrot.slane %v73_v29, %v77_v28  ;;  %v82_v32 = vrot.slane %v73_v29, %v81_v30  ;;  %v401_v48 = vld [vmem:[%s685_s4] ss:$0 sm:$0xff]  ;;  %s554_s4 = scalar_lea.vmem %s379_s11, 256 }
  0x42   :  { %140 = vmatprep.subr.bf16.mxu0 %v460_v7  ;;  %p555_p10 = scmp.ne.s32.totalorder %s379_s11, %s554_s4  ;;  %p560_p12 = scmp.lt.s32.totalorder %s554_s4, %s554_s4 }
  0x44   :  { %425 = vmatpush3.bf16.msra.mxu1 %v469_v15  ;;  %p561_p13 = por %p560_p12, %p559_p11 }
  0x45   :  { %141 = vmatpush1.bf16.msra.mxu0 %v462_v10  ;;  %426 = vmatprep.subr.bf16.mxu1 %v470_v16 }
  0x46   :  { %p562_p0 = pnand %p561_p13, %p555_p10 }
  0x48   :  { %400 = vmatmul.mubr.msk.bf16.vlgmr.msra.gmra.mrb[0].mxu0 %vm130_vm0, %v463_v14  ;;  %427 = vmatpush3.bf16.msra.mxu1 %v471_v17 }
  0x49   :  { %428 = vmatprep.subr.bf16.mxu1 %v472_v18 }
  0x4c   :  { %429 = vmatpush3.bf16.msra.mxu1 %v473_v19 }
  0x4d   :  { %430 = vmatprep.subr.bf16.mxu1 %v474_v20 }
  0x50   :  { %431 = vmatpush3.bf16.msra.mxu1 %v475_v21 }
  0x51   :  { %432 = vmatprep.subr.bf16.mxu1 %v476_v22 }
  0x54   :  { %433 = vmatpush3.bf16.msra.mxu1 %v477_v23 }
  0x55   :  { %434 = vmatprep.subr.bf16.mxu1 %v478_v24 }
  0x58   :  { %435 = vmatpush3.bf16.msra.mxu1 %v479_v25 }
 0x11b   :  { %v168_v33 = vpop.f32.mrb[0].mxu0 }
 0x11c   :  { %v169_v34 = vadd.f32 %v168_v33, %v78_v31  ;;  %v170_v35 = vpop.f32.mrb[1].mxu0 }
 0x11d   :  { %v171_v36 = vadd.f32 %v170_v35, %v82_v32  ;;  %v172_v37 = vpop.f32.mrb[2].mxu0 }
 0x11e   :  { %v173_v38 = vadd.f32 %v172_v37, %v78_v31  ;;  %v174_v39 = vpop.f32.mrb[3].mxu0  ;;  %v177_v41 = vmax.f32 %v169_v34, 0.0 }
 0x11f   :  { %v175_v40 = vadd.f32 %v174_v39, %v82_v32  ;;  %v178_v43 = vmax.f32 %v171_v36, 0.0 }
 0x120   :  { %v179_v42 = vmax.f32 %v173_v38, 0.0 }
 0x121   :  { %v180_v44 = vmax.f32 %v175_v40, 0.0 }
 0x122   :  { %v181_v45 = vpack.c.bf16 %v179_v42, %v177_v41 }
 0x123   :  { %v182_v46 = vpack.c.bf16 %v180_v44, %v178_v43 }
 0x125   :  { %350 = vmatprep.mubr.bf16.mxu1 %v182_v46 }
 0x126   :  { %351 = vmatmul.mubr.bf16.vlgmr.msra.gmra.mrb[0].mxu1 %v181_v45 }
 0x1f9   :  { %v436_v47 = vpop.f32.mrb[0].mxu1 }
 0x1fa   :  { %v437_v49 = vpop.f32.mrb[1].mxu1 }
 0x1fb   :  { %v438_v50 = vadd.f32 %v437_v49, %v436_v47  ;;  %v439_v51 = vpop.f32.mrb[2].mxu1 }
 0x1fc   :  { %v440_v52 = vpop.f32.mrb[3].mxu1 }
 0x1fd   :  { %v353_v53 = vadd.f32 %v438_v50, %v401_v48  ;;  %v441_v54 = vadd.f32 %v440_v52, %v439_v51 }
 0x1ff   :  { %v418_v55 = vmul.f32 -1.442695, %v353_v53  ;;  %v356_v56 = vadd.f32 %v441_v54, %v401_v48 }
 0x201   :  { %480 = vpow2.f32 %v418_v55  ;;  %v419_v57 = vmul.f32 -1.442695, %v356_v56 }
 0x203   :  { %482 = vpow2.f32 %v419_v57 }
 0x20b   :  { %v481_v58 = vpop.eup %480 }
 0x20c   :  { %v365_v59 = vadd.f32 1.0, %v481_v58 }
 0x20d   :  { %v483_v60 = vpop.eup %482 }
 0x20e   :  { %484 = vrcp.f32 %v365_v59  ;;  %v366_v61 = vadd.f32 1.0, %v483_v60 }
 0x210   :  { %486 = vrcp.f32 %v366_v61 }
 0x218   :  { %v485_v62 = vpop.eup %484 }
 0x219   :  { %371 = vst [vmem:[#allocation8] sm:$0xff] %v485_v62 }
 0x21a   :  { %v487_v63 = vpop.eup %486 }
 0x21b   :  { %372 = vst [vmem:[#allocation8 + $0x8] sm:$0xff] %v487_v63 }
 0x21c   :  { %565 = shalt.err (!%p562_p0)
}
 0x21d   :  { %s566_s14 = scalar_lea.hbm %s686_s5, 256 }
 0x21e   :  { %p567_p1 = scmp.ne.s32.totalorder %s686_s5, %s566_s14  ;;  %p570_p2 = scmp.lt.u32.totalorder %s566_s14, %s686_s5 }
 0x220   :  { %p572_p3 = pnand %p570_p2, %p567_p1 }
 0x222   :  { %575 = shalt.err (!%p572_p3)
}
 0x223   :  { %384 = dma.vmem_to_hbm [thread:$0]  %s379_s11, 256, %s686_s5, [#allocation4], %s583_s28, %s583_s28, %s584_s29  }
 0x224   :  { %580 = dma.done.wait [#allocation4], 256  }
 0x225   :  { %581 = vsyncadd [#allocation4], 4294967040 }
 0x226   :  { %388 = vsyncpa [#allocation3], 1 }
 0x227   :  { %389 = vsyncpa [#allocation6], 1 }
 0x228   :  { %390 = vsyncpa [#allocation4], 1 }

// kernel: tpu_custom_call.1
= control target key start
LH: loop header
LB: loop body
LE: loop exit
PB: predicated region body
PF: predicated region fallthrough
CT: control target
= control target key end

     0   :  { %10 = vsyncpa [#allocation3], 0  ;;  %s681_s0 = inlined_call_operand.hbm [shape: bf16[16,64], index: 0, kind: input, shape index: {}]   ;;  %s682_s1 = inlined_call_operand.hbm [shape: bf16[64,256], index: 1, kind: input, shape index: {}]   ;;  %s683_s2 = inlined_call_operand.vmem [shape: f32[1,256], index: 2, kind: input, shape index: {}]   ;;  %s684_s3 = inlined_call_operand.hbm [shape: bf16[256,128], index: 3, kind: input, shape index: {}]   ;;  %s685_s4 = inlined_call_operand.vmem [shape: f32[1,128], index: 4, kind: input, shape index: {}]   ;;  %s686_s5 = inlined_call_operand.hbm [shape: f32[16,128], index: 5, kind: output, shape index: {}]  }
   0x1   :  { %11 = vsyncpa [#allocation6], 0 }
   0x2   :  { %12 = vsyncpa [#allocation4], 0  ;;  %s582_s18 = smov [#allocation5]   ;;  %s488_s22 = scalar_lea.hbm %s682_s1, 1024 }
   0x3   :  { %s30_s19 = sshll.u32 %s582_s18, 4  ;;  %p489_p0 = scmp.ne.s32.totalorder %s682_s1, %s488_s22  ;;  %s31_s19 = int_to_ptr.vmem [resolvable:$true] %s30_s19 }
   0x4   :  { %p492_p1 = scmp.lt.u32.totalorder %s488_s22, %s682_s1 }
   0x6   :  { %p494_p2 = pnand %p492_p1, %p489_p0 }
   0x8   :  { %497 = shalt.err (!%p494_p2)
}
   0x9   :  { %s498_s27 = scalar_lea.vmem %s31_s19, 1024  ;;  %p503_p4 = scmp.lt.s32.totalorder %s31_s19, %s31_s19 }
   0xa   :  { %p499_p3 = scmp.ne.s32.totalorder %s31_s19, %s498_s27  ;;  %p504_p5 = scmp.lt.s32.totalorder %s498_s27, %s498_s27 }
   0xc   :  { %p505_p6 = por %p504_p5, %p503_p4 }
   0xe   :  { %p506_p7 = pnand %p505_p6, %p499_p3 }
  0x10   :  { %509 = shalt.err (!%p506_p7)
}
  0x11   :  { %s583_s28 = smov 128   ;;  %s584_s29 = smov 8  }
  0x12   :  { %36 = dma.hbm_to_vmem [thread:$0]  %s682_s1, 1024, %s31_s19, [#allocation6], %s583_s28, %s583_s28, %s584_s29  }
  0x13   :  { %s585_s7 = smov [#allocation2]   ;;  %s510_s11 = scalar_lea.hbm %s681_s0, 128 }
  0x14   :  { %s18_s8 = sshll.u32 %s585_s7, 4  ;;  %p511_p8 = scmp.ne.s32.totalorder %s681_s0, %s510_s11  ;;  %s19_s8 = int_to_ptr.vmem [resolvable:$true] %s18_s8 }
  0x15   :  { %p514_p9 = scmp.lt.u32.totalorder %s510_s11, %s681_s0 }
  0x17   :  { %p516_p10 = pnand %p514_p9, %p511_p8 }
  0x19   :  { %519 = shalt.err (!%p516_p10)
}
  0x1a   :  { %s520_s16 = scalar_lea.vmem %s19_s8, 128  ;;  %p525_p12 = scmp.lt.s32.totalorder %s19_s8, %s19_s8 }
  0x1b   :  { %p521_p11 = scmp.ne.s32.totalorder %s19_s8, %s520_s16  ;;  %p526_p13 = scmp.lt.s32.totalorder %s520_s16, %s520_s16 }
  0x1d   :  { %p527_p0 = por %p526_p13, %p525_p12 }
  0x1f   :  { %p528_p1 = pnand %p527_p0, %p521_p11 }
  0x21   :  { %531 = shalt.err (!%p528_p1)
}
  0x22   :  { %s586_s1 = smov 64   ;;  %s587_s17 = smov 4  }
  0x23   :  { %24 = dma.hbm_to_vmem [thread:$0]  %s681_s0, 128, %s19_s8, [#allocation3], %s586_s1, %s586_s1, %s587_s17  }
  0x24   :  { %s588_s20 = smov [#allocation7]   ;;  %s532_s24 = scalar_lea.hbm %s684_s3, 2048 }
  0x25   :  { %s44_s21 = sshll.u32 %s588_s20, 4  ;;  %p533_p2 = scmp.ne.s32.totalorder %s684_s3, %s532_s24  ;;  %s45_s21 = int_to_ptr.vmem [resolvable:$true] %s44_s21 }
  0x26   :  { %p536_p3 = scmp.lt.u32.totalorder %s532_s24, %s684_s3 }
  0x28   :  { %p538_p4 = pnand %p536_p3, %p533_p2 }
  0x2a   :  { %541 = shalt.err (!%p538_p4)
}
  0x2b   :  { %s542_s6 = scalar_lea.vmem %s45_s21, 2048  ;;  %p547_p6 = scmp.lt.s32.totalorder %s45_s21, %s45_s21 }
  0x2c   :  { %p543_p5 = scmp.ne.s32.totalorder %s45_s21, %s542_s6  ;;  %p548_p7 = scmp.lt.s32.totalorder %s542_s6, %s542_s6 }
  0x2e   :  { %p549_p8 = por %p548_p7, %p547_p6 }
  0x30   :  { %p550_p9 = pnand %p549_p8, %p543_p5 }
  0x32   :  { %553 = shalt.err (!%p550_p9)
}
  0x33   :  { %50 = dma.hbm_to_vmem [thread:$0]  %s684_s3, 2048, %s45_s21, [#allocation6], %s586_s1, %s586_s1, %s587_s17  }
  0x34   :  { %576 = dma.done.wait [#allocation3], 128  }
  0x35   :  { %577 = vsyncadd [#allocation3], 4294967168 }
  0x36   :  { %578 = dma.done.wait [#allocation6], 3072  }
  0x37   :  { %579 = vsyncadd [#allocation6], 4294964224  ;;  %v589_v0 = vmov 0   ;;  %v451_v1 = vld [vmem:[#allocation5 + $0x4] ss:$8 sps:$4 sm:$0xff]   ;;  %v468_v13 = vld [vmem:[#allocation7 + $0x50] sm:$0xff]   ;;  %v75_v26 = vlaneseq }
  0x38   :  { %166 = vmatprep.mubr.bf16.mxu0 %v589_v0  ;;  %v453_v2 = vld [vmem:[#allocation5] ss:$8 sps:$4 sm:$0xff]   ;;  %134 = vmatprep.subr.bf16.mxu0 %v451_v1  ;;  %v454_v3 = vld [vmem:[#allocation5 + $0x14] ss:$8 sps:$4 sm:$0xff]   ;;  %v456_v4 = vld [vmem:[#allocation5 + $0x10] ss:$8 sps:$4 sm:$0xff]  }
  0x39   :  { %135 = vmatpush1.bf16.msra.mxu0 %v453_v2  ;;  %v457_v5 = vld [vmem:[#allocation5 + $0x24] ss:$8 sps:$4 sm:$0xff]   ;;  %v459_v6 = vld [vmem:[#allocation5 + $0x20] ss:$8 sps:$4 sm:$0xff]   ;;  %v460_v7 = vld [vmem:[#allocation5 + $0x34] ss:$8 sps:$4 sm:$0xff]  }
  0x3a   :  { %136 = vmatprep.subr.bf16.mxu0 %v454_v3  ;;  %v464_v8 = vld [vmem:[#allocation7 + $0x40] sm:$0xff]   ;;  %v462_v10 = vld [vmem:[#allocation5 + $0x30] ss:$8 sps:$4 sm:$0xff]   ;;  %v466_v11 = vld [vmem:[#allocation7 + $0x48] sm:$0xff]   ;;  %vm130_vm0 = vcmask 523264   ;;  %v76_v27 = vshrl.u32 %v75_v26, 7 }
  0x3b   :  { %v465_v9 = vld [vmem:[#allocation7] sm:$0xff]   ;;  %420 = vmatprep.subr.bf16.mxu1 %v464_v8  ;;  %v467_v12 = vld [vmem:[#allocation7 + $0x8] sm:$0xff]   ;;  %v463_v14 = vld [vmem:[#allocation2] sm:$0xff]   ;;  %s590_s10 = smov [#allocation8]  }
  0x3c   :  { %421 = vmatpush3.bf16.msra.mxu1 %v465_v9  ;;  %v469_v15 = vld [vmem:[#allocation7 + $0x10] sm:$0xff]   ;;  %v470_v16 = vld [vmem:[#allocation7 + $0x58] sm:$0xff]   ;;  %v472_v18 = vld [vmem:[#allocation7 + $0x60] sm:$0xff]   ;;  %v77_v28 = vsub.s32 0, %v76_v27  ;;  %v81_v30 = vsub.s32 1, %v76_v27  ;;  %s378_s11 = sshll.u32 %s590_s10, 4  ;;  %s379_s11 = int_to_ptr.vmem [resolvable:$true] %s378_s11 }
  0x3d   :  { %137 = vmatpush1.bf16.msra.mxu0 %v456_v4  ;;  %422 = vmatprep.subr.bf16.mxu1 %v466_v11  ;;  %v471_v17 = vld [vmem:[#allocation7 + $0x18] sm:$0xff]   ;;  %v473_v19 = vld [vmem:[#allocation7 + $0x20] sm:$0xff]   ;;  %v474_v20 = vld [vmem:[#allocation7 + $0x68] sm:$0xff]   ;;  %p559_p11 = scmp.lt.s32.totalorder %s379_s11, %s379_s11 }
  0x3e   :  { %138 = vmatprep.subr.bf16.mxu0 %v457_v5  ;;  %v475_v21 = vld [vmem:[#allocation7 + $0x28] sm:$0xff]   ;;  %v476_v22 = vld [vmem:[#allocation7 + $0x70] sm:$0xff]   ;;  %v478_v24 = vld [vmem:[#allocation7 + $0x78] sm:$0xff]  }
  0x3f   :  { %v477_v23 = vld [vmem:[#allocation7 + $0x30] sm:$0xff]   ;;  %v479_v25 = vld [vmem:[#allocation7 + $0x38] sm:$0xff]  }
  0x40   :  { %423 = vmatpush3.bf16.msra.mxu1 %v467_v12  ;;  %v73_v29 = vld [vmem:[%s683_s2] sm:$0x3] }
  0x41   :  { %139 = vmatpush1.bf16.msra.mxu0 %v459_v6  ;;  %424 = vmatprep.subr.bf16.mxu1 %v468_v13  ;;  %v78_v31 = vrot.slane %v73_v29, %v77_v28  ;;  %v82_v32 = vrot.slane %v73_v29, %v81_v30  ;;  %v401_v48 = vld [vmem:[%s685_s4] ss:$0 sm:$0xff]  ;;  %s554_s4 = scalar_lea.vmem %s379_s11, 256 }
  0x42   :  { %140 = vmatprep.subr.bf16.mxu0 %v460_v7  ;;  %p555_p10 = scmp.ne.s32.totalorder %s379_s11, %s554_s4  ;;  %p560_p12 = scmp.lt.s32.totalorder %s554_s4, %s554_s4 }
  0x44   :  { %425 = vmatpush3.bf16.msra.mxu1 %v469_v15  ;;  %p561_p13 = por %p560_p12, %p559_p11 }
  0x45   :  { %141 = vmatpush1.bf16.msra.mxu0 %v462_v10  ;;  %426 = vmatprep.subr.bf16.mxu1 %v470_v16 }
  0x46   :  { %p562_p0 = pnand %p561_p13, %p555_p10 }
  0x48   :  { %400 = vmatmul.mubr.msk.bf16.vlgmr.msra.gmra.mrb[0].mxu0 %vm130_vm0, %v463_v14  ;;  %427 = vmatpush3.bf16.msra.mxu1 %v471_v17 }
  0x49   :  { %428 = vmatprep.subr.bf16.mxu1 %v472_v18 }
  0x4c   :  { %429 = vmatpush3.bf16.msra.mxu1 %v473_v19 }
  0x4d   :  { %430 = vmatprep.subr.bf16.mxu1 %v474_v20 }
  0x50   :  { %431 = vmatpush3.bf16.msra.mxu1 %v475_v21 }
  0x51   :  { %432 = vmatprep.subr.bf16.mxu1 %v476_v22 }
  0x54   :  { %433 = vmatpush3.bf16.msra.mxu1 %v477_v23 }
  0x55   :  { %434 = vmatprep.subr.bf16.mxu1 %v478_v24 }
  0x58   :  { %435 = vmatpush3.bf16.msra.mxu1 %v479_v25 }
 0x11b   :  { %v168_v33 = vpop.f32.mrb[0].mxu0 }
 0x11c   :  { %v169_v34 = vadd.f32 %v168_v33, %v78_v31  ;;  %v170_v35 = vpop.f32.mrb[1].mxu0 }
 0x11d   :  { %v171_v36 = vadd.f32 %v170_v35, %v82_v32  ;;  %v172_v37 = vpop.f32.mrb[2].mxu0 }
 0x11e   :  { %v173_v38 = vadd.f32 %v172_v37, %v78_v31  ;;  %v174_v39 = vpop.f32.mrb[3].mxu0  ;;  %v177_v41 = vmax.f32 %v169_v34, 0.0 }
 0x11f   :  { %v175_v40 = vadd.f32 %v174_v39, %v82_v32  ;;  %v178_v43 = vmax.f32 %v171_v36, 0.0 }
 0x120   :  { %v179_v42 = vmax.f32 %v173_v38, 0.0 }
 0x121   :  { %v180_v44 = vmax.f32 %v175_v40, 0.0 }
 0x122   :  { %v181_v45 = vpack.c.bf16 %v179_v42, %v177_v41 }
 0x123   :  { %v182_v46 = vpack.c.bf16 %v180_v44, %v178_v43 }
 0x125   :  { %350 = vmatprep.mubr.bf16.mxu1 %v182_v46 }
 0x126   :  { %351 = vmatmul.mubr.bf16.vlgmr.msra.gmra.mrb[0].mxu1 %v181_v45 }
 0x1f9   :  { %v436_v47 = vpop.f32.mrb[0].mxu1 }
 0x1fa   :  { %v437_v49 = vpop.f32.mrb[1].mxu1 }
 0x1fb   :  { %v438_v50 = vadd.f32 %v437_v49, %v436_v47  ;;  %v439_v51 = vpop.f32.mrb[2].mxu1 }
 0x1fc   :  { %v440_v52 = vpop.f32.mrb[3].mxu1 }
 0x1fd   :  { %v353_v53 = vadd.f32 %v438_v50, %v401_v48  ;;  %v441_v54 = vadd.f32 %v440_v52, %v439_v51 }
 0x1ff   :  { %v418_v55 = vmul.f32 -1.442695, %v353_v53  ;;  %v356_v56 = vadd.f32 %v441_v54, %v401_v48 }
 0x201   :  { %480 = vpow2.f32 %v418_v55  ;;  %v419_v57 = vmul.f32 -1.442695, %v356_v56 }
 0x203   :  { %482 = vpow2.f32 %v419_v57 }
 0x20b   :  { %v481_v58 = vpop.eup %480 }
 0x20c   :  { %v365_v59 = vadd.f32 1.0, %v481_v58 }
 0x20d   :  { %v483_v60 = vpop.eup %482 }
 0x20e   :  { %484 = vrcp.f32 %v365_v59  ;;  %v366_v61 = vadd.f32 1.0, %v483_v60 }
 0x210   :  { %486 = vrcp.f32 %v366_v61 }
 0x218   :  { %v485_v62 = vpop.eup %484 }
 0x219   :  { %371 = vst [vmem:[#allocation8] sm:$0xff] %v485_v62 }
 0x21a   :  { %v487_v63 = vpop.eup %486 }
 0x21b   :  { %372 = vst [vmem:[#allocation8 + $0x8] sm:$0xff] %v487_v63 }
 0x21c   :  { %565 = shalt.err (!%p562_p0)
}
 0x21d   :  { %s566_s14 = scalar_lea.hbm %s686_s5, 256 }
 0x21e   :  { %p567_p1 = scmp.ne.s32.totalorder %s686_s5, %s566_s14  ;;  %p570_p2 = scmp.lt.u32.totalorder %s566_s14, %s686_s5 }
 0x220   :  { %p572_p3 = pnand %p570_p2, %p567_p1 }
 0x222   :  { %575 = shalt.err (!%p572_p3)
}
 0x223   :  { %384 = dma.vmem_to_hbm [thread:$0]  %s379_s11, 256, %s686_s5, [#allocation4], %s583_s28, %s583_s28, %s584_s29  }
 0x224   :  { %580 = dma.done.wait [#allocation4], 256  }
 0x225   :  { %581 = vsyncadd [#allocation4], 4294967040 }
 0x226   :  { %388 = vsyncpa [#allocation3], 1 }
 0x227   :  { %389 = vsyncpa [#allocation6], 1 }
 0x228   :  { %390 = vsyncpa [#allocation4], 1 }

</bundles_post_ra>
